<compile_context>
chip_gen: v7x
topology: tpu7x:2x2x1
jax: 0.10.0
libtpu: 0.0.40
codegen_flags: <defaults>
</compile_context>

<pallas_src>
import functools

import jax
import jax.numpy as jnp
from jax.experimental import pallas as pl
from jax.experimental.pallas import tpu as pltpu


def _mlp_kernel(x_ref, w1_ref, b1_ref, w2_ref, b2_ref, w3_ref, b3_ref, o_ref):
    # Cast x to bf16 on the VPU (input arrives straight from HBM as f32).
    x = x_ref[...].astype(jnp.bfloat16)

    # Layer 1: bf16 x bf16 -> f32 on the MXU; bias + ReLU on the VPU in f32.
    h1 = jnp.dot(x, w1_ref[...], preferred_element_type=jnp.float32)
    h1 = jnp.maximum(h1 + b1_ref[...], 0.0)

    # Layer 2: same pattern (re-quantize activations to bf16 for the MXU).
    h2 = jnp.dot(h1.astype(jnp.bfloat16), w2_ref[...],
                 preferred_element_type=jnp.float32)
    h2 = jnp.maximum(h2 + b2_ref[...], 0.0)

    # Layer 3 (logit head, out_dim = 1): avoid an N=1 MXU pass — VPU multiply
    # against the broadcast w3 row + an XLU lane reduction. b3 scalar in SMEM.
    logit = jnp.sum(h2 * w3_ref[...], axis=-1, keepdims=True) + b3_ref[0, 0]
    o_ref[...] = logit.astype(o_ref.dtype)


def _round_up(n, m):
    return ((n + m - 1) // m) * m


def _pad_to(a, shape):
    pads = tuple((0, t - s) for s, t in zip(a.shape, shape))
    if all(p == (0, 0) for p in pads):
        return a
    return jnp.pad(a, pads)


def _derive_tiling(batch, input_dim, h_p, h2_p, tile_m_cap):
    """Shape/VMEM-derived row tile and scoped-VMEM limit."""
    # Resident weights/biases. Assume the worst case (double-buffered) so the
    # budget still holds if the single-buffer request is unavailable.
    weight_bytes = 2 * (input_dim * h_p * 2      # w1 (bf16)
                        + h_p * 4                # b1 (f32)
                        + h_p * h2_p * 2         # w2 (bf16)
                        + h2_p * 4               # b2 (f32)
                        + h2_p * 4)              # w3 row (f32)
    # Live VMEM bytes per batch row:
    #   2 x-tile buffers (f32) + 2 output buffers (lane-padded to 128, f32)
    #   + f32 h1 + bf16 h1 recast + f32 h2 intermediates.
    per_row_bytes = (2 * input_dim * 4
                     + 2 * 128 * 4
                     + h_p * (4 + 2)
                     + h2_p * 4)

    try:
        vmem_cap = int(pltpu.get_tpu_info().vmem_capacity_bytes)
    except Exception:
        vmem_cap = 64 * 1024 * 1024   # conservative: v7x per-core VMEM

    # Stay comfortably inside physical VMEM on every generation
    # (v5e/v6e: 128 MiB, v7x: 64 MiB per TensorCore).
    budget = min(int(0.6 * vmem_cap), 80 * 1024 * 1024)
    avail = max(budget - weight_bytes, 2 * 1024 * 1024)
    tm_cap = max((avail // per_row_bytes) // 8 * 8, 8)
    tm_cap = min(tm_cap, tile_m_cap)

    if batch <= 8:
        tm = batch                      # full-dim block
    else:
        tm = max(min(tm_cap, (batch // 8) * 8), 8)
        # Keep >= 2 grid steps for sizeable batches so the "parallel" batch
        # axis can span both TensorCores on v7x (megacore).
        if batch >= 1024:
            tm = min(tm, _round_up(pl.cdiv(batch, 2), 8))

    need = weight_bytes + tm * per_row_bytes + 4 * 1024 * 1024  # + margin
    vmem_limit = int(min(max(need, 32 * 1024 * 1024), vmem_cap))
    return tm, vmem_limit


@functools.partial(jax.jit, static_argnames=("tile_m", "single_buffer_weights"))
def _forward_impl(x, params, *, tile_m, single_buffer_weights):
    batch, input_dim = x.shape
    hid = params["w1"].shape[1]
    hid2 = params["w2"].shape[1]

    # Pad only the (cheap, resident) weight output dims to 128 lanes; x and the
    # K dims are consumed as full-dim blocks without any wrapper materialization.
    h_p = _round_up(hid, 128)
    h2_p = _round_up(hid2, 128)

    tm, vmem_limit = _derive_tiling(batch, input_dim, h_p, h2_p, tile_m)

    f32, bf16 = jnp.float32, jnp.bfloat16
    w1 = _pad_to(params["w1"].astype(bf16), (input_dim, h_p))
    b1 = _pad_to(params["b1"].astype(f32), (1, h_p))
    w2 = _pad_to(params["w2"].astype(bf16), (h_p, h2_p))
    b2 = _pad_to(params["b2"].astype(f32), (1, h2_p))
    w3 = _pad_to(params["w3"].astype(f32).reshape(1, hid2), (1, h2_p))
    b3 = params["b3"].astype(f32).reshape(1, 1)

    def _resident_spec(shape):
        # Constant index_map => block never changes; single-buffer it to save
        # VMEM (fall back to default double-buffering if unsupported).
        if single_buffer_weights:
            return pl.BlockSpec(shape, lambda i: (0, 0),
                                pipeline_mode=pl.Buffered(1))
        return pl.BlockSpec(shape, lambda i: (0, 0))

    grid = (pl.cdiv(batch, tm),)

    flops = 2 * batch * (input_dim * h_p + h_p * h2_p + h2_p)
    bytes_accessed = (x.size * 4
                      + w1.size * 2 + w2.size * 2
                      + (b1.size + b2.size + w3.size + b3.size) * 4
                      + batch * 4)

    out = pl.pallas_call(
        _mlp_kernel,
        out_shape=jax.ShapeDtypeStruct((batch, 1), f32),
        grid=grid,
        in_specs=[
            pl.BlockSpec((tm, input_dim), lambda i: (i, 0)),   # x tile (pipelined)
            _resident_spec((input_dim, h_p)),                  # w1
            _resident_spec((1, h_p)),                          # b1
            _resident_spec((h_p, h2_p)),                       # w2
            _resident_spec((1, h2_p)),                         # b2
            _resident_spec((1, h2_p)),                         # w3 row
            pl.BlockSpec(memory_space=pltpu.MemorySpace.SMEM),  # b3 scalar
        ],
        out_specs=pl.BlockSpec((tm, 1), lambda i: (i, 0)),
        compiler_params=pltpu.CompilerParams(
            dimension_semantics=("parallel",),
            vmem_limit_bytes=vmem_limit,
        ),
        cost_estimate=pl.CostEstimate(
            flops=flops, transcendentals=0, bytes_accessed=bytes_accessed),
    )(x, w1, b1, w2, b2, w3, b3)

    return out


def strong_classifier_forward(x, params, *, tile_m=2048):
    """Fused forward pass of StrongClassifier on TPU via Pallas.

    x: (batch, input_dim) float32
    params: dict with w1 (in,h), b1 (1,h), w2 (h,h//2), b2 (1,h//2),
            w3 (h//2,1), b3 (1,1)   [weights stored as (in, out), i.e. the
            transpose of PyTorch nn.Linear.weight]
    returns: (batch, 1) float32 logits
    """
    try:
        return _forward_impl(x, params, tile_m=tile_m,
                             single_buffer_weights=True)
    except Exception:
        # Fallback for environments where BlockSpec(pipeline_mode=pl.Buffered(1))
        # is unavailable/rejected: default double-buffered weight blocks.
        return _forward_impl(x, params, tile_m=tile_m,
                             single_buffer_weights=False)


def init_params(key, input_dim, hidden_dim=256):
    """Deterministic synthetic init (PyTorch-like uniform fan-in scaling)."""
    k1, k2, k3, k4, k5, k6 = jax.random.split(key, 6)
    h = hidden_dim
    h2 = hidden_dim // 2

    def uinit(k, shape, fan_in):
        bound = 1.0 / jnp.sqrt(jnp.float32(fan_in))
        return jax.random.uniform(k, shape, jnp.float32, -bound, bound)

    return {
        "w1": uinit(k1, (input_dim, h), input_dim),
        "b1": uinit(k2, (1, h), input_dim),
        "w2": uinit(k3, (h, h2), h),
        "b2": uinit(k4, (1, h2), h),
        "w3": uinit(k5, (h2, 1), h2),
        "b3": uinit(k6, (1, 1), h2),
    }


def reference_forward_f32(x, p):
    h1 = jnp.maximum(x @ p["w1"] + p["b1"], 0.0)
    h2 = jnp.maximum(h1 @ p["w2"] + p["b2"], 0.0)
    return h2 @ p["w3"] + p["b3"]


def reference_forward_bf16(x, p):
    """Reference that mirrors the kernel's bf16 operand casts exactly."""
    f32, bf16 = jnp.float32, jnp.bfloat16
    xb = x.astype(bf16).astype(f32)
    w1 = p["w1"].astype(bf16).astype(f32)
    w2 = p["w2"].astype(bf16).astype(f32)
    h1 = jnp.maximum(xb @ w1 + p["b1"], 0.0)
    h1 = h1.astype(bf16).astype(f32)
    h2 = jnp.maximum(h1 @ w2 + p["b2"], 0.0)
    return h2 @ p["w3"] + p["b3"]


if __name__ == "__main__":
    key = jax.random.PRNGKey(0)
    kx, kp = jax.random.split(key)

    batch = 8
    input_dim = 32
    hidden_dim = 32  # small shapes for the synthetic test

    x = jax.random.normal(kx, (batch, input_dim), dtype=jnp.float32)
    params = init_params(kp, input_dim, hidden_dim)

    out = strong_classifier_forward(x, params)
    out = jax.block_until_ready(out)

    assert out.shape == (batch, 1), out.shape

    # Tight check against a reference with identical bf16 operand casts.
    ref_bf = reference_forward_bf16(x, params)
    assert jnp.allclose(out, ref_bf, atol=1e-4, rtol=1e-4), "mismatch vs bf16 ref"

    # Loose sanity check against the full-f32 reference.
    ref32 = reference_forward_f32(x, params)
    assert jnp.allclose(out, ref32, atol=1e-1, rtol=1e-1), "mismatch vs f32 ref"

    print("KERNEL_OK")
</pallas_src>

<mosaic_0001>
module attributes {stable_mosaic.version = 11 : i64} {
  func.func @_mlp_kernel(%arg0: i32, %arg1: memref<8x32xf32, #tpu.memory_space<vmem>>, %arg2: memref<32x128xbf16, #tpu.memory_space<vmem>>, %arg3: memref<1x128xf32, #tpu.memory_space<vmem>>, %arg4: memref<128x128xbf16, #tpu.memory_space<vmem>>, %arg5: memref<1x128xf32, #tpu.memory_space<vmem>>, %arg6: memref<1x128xf32, #tpu.memory_space<vmem>>, %arg7: memref<1x1xf32, #tpu.memory_space<smem>>, %arg8: memref<8x1xf32, #tpu.memory_space<vmem>>) attributes {dimension_semantics = [#tpu.dimension_semantics<parallel>], iteration_bounds = array<i64: 1>, scalar_prefetch = 0 : i64, scratch_operands = 0 : i64, tpu.core_type = #tpu.core_type<tc>, window_params = [{transform_indices = @transform_0, window_bounds = array<i64: 8, 32>}, {pipeline_mode = #tpu.pipeline_mode<synchronous>, transform_indices = @transform_1, window_bounds = array<i64: 32, 128>}, {pipeline_mode = #tpu.pipeline_mode<synchronous>, transform_indices = @transform_2, window_bounds = array<i64: 1, 128>}, {pipeline_mode = #tpu.pipeline_mode<synchronous>, transform_indices = @transform_3, window_bounds = array<i64: 128, 128>}, {pipeline_mode = #tpu.pipeline_mode<synchronous>, transform_indices = @transform_4, window_bounds = array<i64: 1, 128>}, {pipeline_mode = #tpu.pipeline_mode<synchronous>, transform_indices = @transform_5, window_bounds = array<i64: 1, 128>}, {transform_indices = @transform_6, window_bounds = array<i64: 1, 1>}, {transform_indices = @transform_7, window_bounds = array<i64: 8, 1>}]} {
    %c0 = arith.constant 0 : index
    %c0_0 = arith.constant 0 : index
    %0 = vector.load %arg1[%c0, %c0_0] : memref<8x32xf32, #tpu.memory_space<vmem>>, vector<8x32xf32>
    %1 = arith.truncf %0 : vector<8x32xf32> to vector<8x32xbf16>
    %c0_1 = arith.constant 0 : index
    %c0_2 = arith.constant 0 : index
    %2 = vector.load %arg2[%c0_1, %c0_2] : memref<32x128xbf16, #tpu.memory_space<vmem>>, vector<32x128xbf16>
    %cst = arith.constant dense<0.000000e+00> : vector<8x128xf32>
    %3 = tpu.matmul %1, %2, %cst {dimension_numbers = #tpu.dot_dimension_numbers<[1], [0], [0], [1], [0, 0, 1, 1], [], []>} : vector<8x32xbf16>, vector<32x128xbf16>, vector<8x128xf32> -> vector<8x128xf32>
    %c0_3 = arith.constant 0 : index
    %c0_4 = arith.constant 0 : index
    %4 = vector.load %arg3[%c0_3, %c0_4] : memref<1x128xf32, #tpu.memory_space<vmem>>, vector<1x128xf32>
    %5 = vector.broadcast %4 : vector<1x128xf32> to vector<8x128xf32>
    %6 = arith.addf %3, %5 : vector<8x128xf32>
    %cst_5 = arith.constant 0.000000e+00 : f32
    %7 = vector.broadcast %cst_5 : f32 to vector<8x128xf32>
    %8 = arith.maximumf %6, %7 : vector<8x128xf32>
    %9 = arith.truncf %8 : vector<8x128xf32> to vector<8x128xbf16>
    %c0_6 = arith.constant 0 : index
    %c0_7 = arith.constant 0 : index
    %10 = vector.load %arg4[%c0_6, %c0_7] : memref<128x128xbf16, #tpu.memory_space<vmem>>, vector<128x128xbf16>
    %cst_8 = arith.constant dense<0.000000e+00> : vector<8x128xf32>
    %11 = tpu.matmul %9, %10, %cst_8 {dimension_numbers = #tpu.dot_dimension_numbers<[1], [0], [0], [1], [0, 0, 1, 1], [], []>} : vector<8x128xbf16>, vector<128x128xbf16>, vector<8x128xf32> -> vector<8x128xf32>
    %c0_9 = arith.constant 0 : index
    %c0_10 = arith.constant 0 : index
    %12 = vector.load %arg5[%c0_9, %c0_10] : memref<1x128xf32, #tpu.memory_space<vmem>>, vector<1x128xf32>
    %13 = vector.broadcast %12 : vector<1x128xf32> to vector<8x128xf32>
    %14 = arith.addf %11, %13 : vector<8x128xf32>
    %cst_11 = arith.constant 0.000000e+00 : f32
    %15 = vector.broadcast %cst_11 : f32 to vector<8x128xf32>
    %16 = arith.maximumf %14, %15 : vector<8x128xf32>
    %c0_12 = arith.constant 0 : index
    %c0_13 = arith.constant 0 : index
    %17 = vector.load %arg6[%c0_12, %c0_13] : memref<1x128xf32, #tpu.memory_space<vmem>>, vector<1x128xf32>
    %18 = vector.broadcast %17 : vector<1x128xf32> to vector<8x128xf32>
    %19 = arith.mulf %16, %18 : vector<8x128xf32>
    %cst_14 = arith.constant dense<0.000000e+00> : vector<8xf32>
    %20 = vector.multi_reduction <add>, %19, %cst_14 [1] : vector<8x128xf32> to vector<8xf32>
    %21 = vector.shape_cast %20 : vector<8xf32> to vector<8x1xf32>
    %c0_15 = arith.constant 0 : index
    %c0_16 = arith.constant 0 : index
    %22 = memref.load %arg7[%c0_15, %c0_16] : memref<1x1xf32, #tpu.memory_space<smem>>
    %23 = vector.broadcast %22 : f32 to vector<8x1xf32>
    %24 = arith.addf %21, %23 : vector<8x1xf32>
    %c0_17 = arith.constant 0 : index
    %c0_18 = arith.constant 0 : index
    %25 = vector.load %arg8[%c0_17, %c0_18] : memref<8x1xf32, #tpu.memory_space<vmem>>, vector<8x1xf32>
    tpu.vector_store %arg8[%c0_17, %c0_18], %24 {strides = array<i32>} : memref<8x1xf32, #tpu.memory_space<vmem>>, vector<8x1xf32>,
    return
  }
  func.func @transform_0(%arg0: i32) -> (i32, i32) {
    %c0_i32 = arith.constant 0 : i32
    %c0_i32_0 = arith.constant 0 : i32
    return %arg0, %c0_i32 : i32, i32
  }
  func.func @transform_1(%arg0: i32) -> (i32, i32) {
    %c0_i32 = arith.constant 0 : i32
    %c0_i32_0 = arith.constant 0 : i32
    %c0_i32_1 = arith.constant 0 : i32
    return %c0_i32, %c0_i32_0 : i32, i32
  }
  func.func @transform_2(%arg0: i32) -> (i32, i32) {
    %c0_i32 = arith.constant 0 : i32
    %c0_i32_0 = arith.constant 0 : i32
    %c0_i32_1 = arith.constant 0 : i32
    return %c0_i32, %c0_i32_0 : i32, i32
  }
  func.func @transform_3(%arg0: i32) -> (i32, i32) {
    %c0_i32 = arith.constant 0 : i32
    %c0_i32_0 = arith.constant 0 : i32
    %c0_i32_1 = arith.constant 0 : i32
    return %c0_i32, %c0_i32_0 : i32, i32
  }
  func.func @transform_4(%arg0: i32) -> (i32, i32) {
    %c0_i32 = arith.constant 0 : i32
    %c0_i32_0 = arith.constant 0 : i32
    %c0_i32_1 = arith.constant 0 : i32
    return %c0_i32, %c0_i32_0 : i32, i32
  }
  func.func @transform_5(%arg0: i32) -> (i32, i32) {
    %c0_i32 = arith.constant 0 : i32
    %c0_i32_0 = arith.constant 0 : i32
    %c0_i32_1 = arith.constant 0 : i32
    return %c0_i32, %c0_i32_0 : i32, i32
  }
  func.func @transform_6(%arg0: i32) -> (i32, i32) {
    %c0_i32 = arith.constant 0 : i32
    %c0_i32_0 = arith.constant 0 : i32
    %c0_i32_1 = arith.constant 0 : i32
    return %c0_i32, %c0_i32_0 : i32, i32
  }
  func.func @transform_7(%arg0: i32) -> (i32, i32) {
    %c0_i32 = arith.constant 0 : i32
    %c0_i32_0 = arith.constant 0 : i32
    return %arg0, %c0_i32 : i32, i32
  }
}

module attributes {stable_mosaic.version = 11 : i64} {
  func.func @_mlp_kernel(%arg0: i32, %arg1: memref<8x32xf32, #tpu.memory_space<vmem>>, %arg2: memref<32x128xbf16, #tpu.memory_space<vmem>>, %arg3: memref<1x128xf32, #tpu.memory_space<vmem>>, %arg4: memref<128x128xbf16, #tpu.memory_space<vmem>>, %arg5: memref<1x128xf32, #tpu.memory_space<vmem>>, %arg6: memref<1x128xf32, #tpu.memory_space<vmem>>, %arg7: memref<1x1xf32, #tpu.memory_space<smem>>, %arg8: memref<8x1xf32, #tpu.memory_space<vmem>>) attributes {dimension_semantics = [#tpu.dimension_semantics<parallel>], iteration_bounds = array<i64: 1>, scalar_prefetch = 0 : i64, scratch_operands = 0 : i64, tpu.core_type = #tpu.core_type<tc>, window_params = [{transform_indices = @transform_0, window_bounds = array<i64: 8, 32>}, {pipeline_mode = #tpu.pipeline_mode<synchronous>, transform_indices = @transform_1, window_bounds = array<i64: 32, 128>}, {pipeline_mode = #tpu.pipeline_mode<synchronous>, transform_indices = @transform_2, window_bounds = array<i64: 1, 128>}, {pipeline_mode = #tpu.pipeline_mode<synchronous>, transform_indices = @transform_3, window_bounds = array<i64: 128, 128>}, {pipeline_mode = #tpu.pipeline_mode<synchronous>, transform_indices = @transform_4, window_bounds = array<i64: 1, 128>}, {pipeline_mode = #tpu.pipeline_mode<synchronous>, transform_indices = @transform_5, window_bounds = array<i64: 1, 128>}, {transform_indices = @transform_6, window_bounds = array<i64: 1, 1>}, {transform_indices = @transform_7, window_bounds = array<i64: 8, 1>}]} {
    %c0 = arith.constant 0 : index
    %c0_0 = arith.constant 0 : index
    %0 = vector.load %arg1[%c0, %c0_0] : memref<8x32xf32, #tpu.memory_space<vmem>>, vector<8x32xf32>
    %1 = arith.truncf %0 : vector<8x32xf32> to vector<8x32xbf16>
    %c0_1 = arith.constant 0 : index
    %c0_2 = arith.constant 0 : index
    %2 = vector.load %arg2[%c0_1, %c0_2] : memref<32x128xbf16, #tpu.memory_space<vmem>>, vector<32x128xbf16>
    %cst = arith.constant dense<0.000000e+00> : vector<8x128xf32>
    %3 = tpu.matmul %1, %2, %cst {dimension_numbers = #tpu.dot_dimension_numbers<[1], [0], [0], [1], [0, 0, 1, 1], [], []>} : vector<8x32xbf16>, vector<32x128xbf16>, vector<8x128xf32> -> vector<8x128xf32>
    %c0_3 = arith.constant 0 : index
    %c0_4 = arith.constant 0 : index
    %4 = vector.load %arg3[%c0_3, %c0_4] : memref<1x128xf32, #tpu.memory_space<vmem>>, vector<1x128xf32>
    %5 = vector.broadcast %4 : vector<1x128xf32> to vector<8x128xf32>
    %6 = arith.addf %3, %5 : vector<8x128xf32>
    %cst_5 = arith.constant 0.000000e+00 : f32
    %7 = vector.broadcast %cst_5 : f32 to vector<8x128xf32>
    %8 = arith.maximumf %6, %7 : vector<8x128xf32>
    %9 = arith.truncf %8 : vector<8x128xf32> to vector<8x128xbf16>
    %c0_6 = arith.constant 0 : index
    %c0_7 = arith.constant 0 : index
    %10 = vector.load %arg4[%c0_6, %c0_7] : memref<128x128xbf16, #tpu.memory_space<vmem>>, vector<128x128xbf16>
    %cst_8 = arith.constant dense<0.000000e+00> : vector<8x128xf32>
    %11 = tpu.matmul %9, %10, %cst_8 {dimension_numbers = #tpu.dot_dimension_numbers<[1], [0], [0], [1], [0, 0, 1, 1], [], []>} : vector<8x128xbf16>, vector<128x128xbf16>, vector<8x128xf32> -> vector<8x128xf32>
    %c0_9 = arith.constant 0 : index
    %c0_10 = arith.constant 0 : index
    %12 = vector.load %arg5[%c0_9, %c0_10] : memref<1x128xf32, #tpu.memory_space<vmem>>, vector<1x128xf32>
    %13 = vector.broadcast %12 : vector<1x128xf32> to vector<8x128xf32>
    %14 = arith.addf %11, %13 : vector<8x128xf32>
    %cst_11 = arith.constant 0.000000e+00 : f32
    %15 = vector.broadcast %cst_11 : f32 to vector<8x128xf32>
    %16 = arith.maximumf %14, %15 : vector<8x128xf32>
    %c0_12 = arith.constant 0 : index
    %c0_13 = arith.constant 0 : index
    %17 = vector.load %arg6[%c0_12, %c0_13] : memref<1x128xf32, #tpu.memory_space<vmem>>, vector<1x128xf32>
    %18 = vector.broadcast %17 : vector<1x128xf32> to vector<8x128xf32>
    %19 = arith.mulf %16, %18 : vector<8x128xf32>
    %cst_14 = arith.constant dense<0.000000e+00> : vector<8xf32>
    %20 = vector.multi_reduction <add>, %19, %cst_14 [1] : vector<8x128xf32> to vector<8xf32>
    %21 = vector.shape_cast %20 : vector<8xf32> to vector<8x1xf32>
    %c0_15 = arith.constant 0 : index
    %c0_16 = arith.constant 0 : index
    %22 = memref.load %arg7[%c0_15, %c0_16] : memref<1x1xf32, #tpu.memory_space<smem>>
    %23 = vector.broadcast %22 : f32 to vector<8x1xf32>
    %24 = arith.addf %21, %23 : vector<8x1xf32>
    %c0_17 = arith.constant 0 : index
    %c0_18 = arith.constant 0 : index
    %25 = vector.load %arg8[%c0_17, %c0_18] : memref<8x1xf32, #tpu.memory_space<vmem>>, vector<8x1xf32>
    tpu.vector_store %arg8[%c0_17, %c0_18], %24 {strides = array<i32>} : memref<8x1xf32, #tpu.memory_space<vmem>>, vector<8x1xf32>,
    return
  }
  func.func @transform_0(%arg0: i32) -> (i32, i32) {
    %c0_i32 = arith.constant 0 : i32
    %c0_i32_0 = arith.constant 0 : i32
    return %arg0, %c0_i32 : i32, i32
  }
  func.func @transform_1(%arg0: i32) -> (i32, i32) {
    %c0_i32 = arith.constant 0 : i32
    %c0_i32_0 = arith.constant 0 : i32
    %c0_i32_1 = arith.constant 0 : i32
    return %c0_i32, %c0_i32_0 : i32, i32
  }
  func.func @transform_2(%arg0: i32) -> (i32, i32) {
    %c0_i32 = arith.constant 0 : i32
    %c0_i32_0 = arith.constant 0 : i32
    %c0_i32_1 = arith.constant 0 : i32
    return %c0_i32, %c0_i32_0 : i32, i32
  }
  func.func @transform_3(%arg0: i32) -> (i32, i32) {
    %c0_i32 = arith.constant 0 : i32
    %c0_i32_0 = arith.constant 0 : i32
    %c0_i32_1 = arith.constant 0 : i32
    return %c0_i32, %c0_i32_0 : i32, i32
  }
  func.func @transform_4(%arg0: i32) -> (i32, i32) {
    %c0_i32 = arith.constant 0 : i32
    %c0_i32_0 = arith.constant 0 : i32
    %c0_i32_1 = arith.constant 0 : i32
    return %c0_i32, %c0_i32_0 : i32, i32
  }
  func.func @transform_5(%arg0: i32) -> (i32, i32) {
    %c0_i32 = arith.constant 0 : i32
    %c0_i32_0 = arith.constant 0 : i32
    %c0_i32_1 = arith.constant 0 : i32
    return %c0_i32, %c0_i32_0 : i32, i32
  }
  func.func @transform_6(%arg0: i32) -> (i32, i32) {
    %c0_i32 = arith.constant 0 : i32
    %c0_i32_0 = arith.constant 0 : i32
    %c0_i32_1 = arith.constant 0 : i32
    return %c0_i32, %c0_i32_0 : i32, i32
  }
  func.func @transform_7(%arg0: i32) -> (i32, i32) {
    %c0_i32 = arith.constant 0 : i32
    %c0_i32_0 = arith.constant 0 : i32
    return %arg0, %c0_i32 : i32, i32
  }
}

</mosaic_0001>

<bundles_post_ra>
// kernel: _forward_impl.1
= control target key start
LH: loop header
LB: loop body
LE: loop exit
PB: predicated region body
PF: predicated region fallthrough
CT: control target
= control target key end

     0   :  { %v296_v0 = vmov 0.0   ;;  %vm297_vm0 = vmmov 0   ;;  %vm53_vm1 = vcmask 261120   ;;  %vm224_vm2 = vcmask 7168   ;;  %s386_s1 = inlined_call_operand.vmem [shape: bf16[32,128], index: 1, kind: input, shape index: {}]   ;;  %s387_s0 = inlined_call_operand.vmem [shape: f32[8,32], index: 0, kind: input, shape index: {}]   ;;  %s388_s3 = inlined_call_operand.vmem [shape: bf16[128,128], index: 3, kind: input, shape index: {}]   ;;  %s389_s2 = inlined_call_operand.vmem [shape: f32[1,128], index: 2, kind: input, shape index: {}]   ;;  %s390_s4 = inlined_call_operand.vmem [shape: f32[1,128], index: 4, kind: input, shape index: {}]   ;;  %s391_s5 = inlined_call_operand.vmem [shape: f32[1,128], index: 5, kind: input, shape index: {}]   ;;  %s392_s6 = inlined_call_operand.<no memory space> [shape: f32[1,1], index: 6, kind: input, shape index: {}]   ;;  %s393_s7 = inlined_call_operand.vmem [shape: f32[8,1], index: 7, kind: output, shape index: {}]  }
   0x1   :  { %256 = vmatprep.subr.bf16.mxu0 %v296_v0  ;;  %v286_v1 = vld [vmem:[%s386_s1] sm:$0xff]   ;;  %260 = vmatprep.mubr.msk.bf16.mxu0 %vm297_vm0, %v296_v0  ;;  %v287_v2 = vld [vmem:[%s386_s1 + $0x8] sm:$0xff]   ;;  %v290_v7 = vld [vmem:[%s388_s3 + $0x10] sm:$0xff]   ;;  %v222_v30 = vstv %s392_s6 }
   0x2   :  { %264 = vmatprep.subr.bf16.mxu1 %v296_v0  ;;  %280 = vmatprep.mubr.msk.bf16.mxu1 %vm297_vm0, %v296_v0  ;;  %v28_v3 = vld [vmem:[%s387_s0] sm:$0xff]  ;;  %v289_v6 = vld [vmem:[%s388_s3 + $0x8] sm:$0xff]   ;;  %v291_v8 = vld [vmem:[%s388_s3 + $0x18] sm:$0xff]  }
   0x3   :  { %257 = vmatpush3.bf16.msra.mxu0 %v286_v1  ;;  %v288_v4 = vld [vmem:[%s388_s3] sm:$0xff]   ;;  %v29_v5 = vpack.c.bf16 %v28_v3, %v28_v3  ;;  %v293_v10 = vld [vmem:[%s388_s3 + $0x28] sm:$0xff]   ;;  %v294_v11 = vld [vmem:[%s388_s3 + $0x30] sm:$0xff]  }
   0x4   :  { %258 = vmatprep.subr.bf16.mxu0 %v296_v0  ;;  %265 = vmatpush3.bf16.msra.mxu1 %v288_v4  ;;  %v292_v9 = vld [vmem:[%s388_s3 + $0x20] sm:$0xff]   ;;  %v295_v12 = vld [vmem:[%s388_s3 + $0x38] sm:$0xff]  }
   0x5   :  { %266 = vmatprep.subr.bf16.mxu1 %v296_v0  ;;  %v230_v13 = vld [vmem:[%s389_s2] ss:$0 sm:$0xff] }
   0x6   :  { %v234_v21 = vld [vmem:[%s390_s4] ss:$0 sm:$0xff] }
   0x7   :  { %259 = vmatpush3.bf16.msra.mxu0 %v287_v2  ;;  %v243_v26 = vld [vmem:[%s391_s5] ss:$0 sm:$0xff] }
   0x8   :  { %267 = vmatpush3.bf16.msra.mxu1 %v289_v6 }
   0x9   :  { %268 = vmatprep.subr.bf16.mxu1 %v296_v0 }
   0xa   :  { %261 = vmatmul.mubr.msk.bf16.vlgmr.msra.gmra.mrb[0].mxu0 %vm53_vm1, %v29_v5 }
   0xc   :  { %269 = vmatpush3.bf16.msra.mxu1 %v290_v7 }
   0xd   :  { %270 = vmatprep.subr.bf16.mxu1 %v296_v0 }
  0x10   :  { %271 = vmatpush3.bf16.msra.mxu1 %v291_v8 }
  0x11   :  { %272 = vmatprep.subr.bf16.mxu1 %v296_v0 }
  0x14   :  { %273 = vmatpush3.bf16.msra.mxu1 %v292_v9 }
  0x15   :  { %274 = vmatprep.subr.bf16.mxu1 %v296_v0 }
  0x18   :  { %275 = vmatpush3.bf16.msra.mxu1 %v293_v10 }
  0x19   :  { %276 = vmatprep.subr.bf16.mxu1 %v296_v0 }
  0x1c   :  { %277 = vmatpush3.bf16.msra.mxu1 %v294_v11 }
  0x1d   :  { %278 = vmatprep.subr.bf16.mxu1 %v296_v0 }
  0x20   :  { %279 = vmatpush3.bf16.msra.mxu1 %v295_v12 }
  0xdd   :  { %v91_v14 = vpop.f32.mrb[0].mxu0 }
  0xde   :  { %v92_v15 = vadd.f32 %v230_v13, %v91_v14  ;;  %v262_v16 = vpop.f32.mrb[1].mxu0 }
  0xdf   :  { %v94_v17 = vpop.f32.mrb[2].mxu0 }
  0xe0   :  { %v97_v18 = vmax.f32 %v92_v15, 0.0  ;;  %v263_v19 = vpop.f32.mrb[3].mxu0 }
  0xe2   :  { %v98_v20 = vpack.c.bf16 %v97_v18, %v97_v18 }
  0xe4   :  { %281 = vmatmul.mubr.bf16.vlgmr.msra.gmra.mrb[0].mxu1 %v98_v20 }
 0x1b7   :  { %v204_v22 = vpop.f32.mrb[0].mxu1 }
 0x1b8   :  { %v205_v23 = vadd.f32 %v234_v21, %v204_v22  ;;  %v282_v24 = vpop.f32.mrb[1].mxu1 }
 0x1b9   :  { %v207_v25 = vpop.f32.mrb[2].mxu1 }
 0x1ba   :  { %v210_v27 = vmax.f32 %v205_v23, 0.0  ;;  %v283_v28 = vpop.f32.mrb[3].mxu1 }
 0x1bc   :  { %v218_v29 = vmul.f32 %v243_v26, %v210_v27 }
 0x1be   :  { %219 = vadd.xlane.f32.xlu0 %v218_v29 }
 0x24b   :  { %v220_v31 = vpop.xlane.xlu0 %219 }
 0x24c   :  { %v223_v32 = vadd.f32 %v222_v30, %v220_v31 }
 0x24e   :  { %225 = vst.msk [vmem:[%s393_s7] sm:$0xff] %vm224_vm2, %v223_v32 }

// kernel: _forward_impl.1
= control target key start
LH: loop header
LB: loop body
LE: loop exit
PB: predicated region body
PF: predicated region fallthrough
CT: control target
= control target key end

     0   :  { %v296_v0 = vmov 0.0   ;;  %vm297_vm0 = vmmov 0   ;;  %vm53_vm1 = vcmask 261120   ;;  %vm224_vm2 = vcmask 7168   ;;  %s386_s1 = inlined_call_operand.vmem [shape: bf16[32,128], index: 1, kind: input, shape index: {}]   ;;  %s387_s0 = inlined_call_operand.vmem [shape: f32[8,32], index: 0, kind: input, shape index: {}]   ;;  %s388_s3 = inlined_call_operand.vmem [shape: bf16[128,128], index: 3, kind: input, shape index: {}]   ;;  %s389_s2 = inlined_call_operand.vmem [shape: f32[1,128], index: 2, kind: input, shape index: {}]   ;;  %s390_s4 = inlined_call_operand.vmem [shape: f32[1,128], index: 4, kind: input, shape index: {}]   ;;  %s391_s5 = inlined_call_operand.vmem [shape: f32[1,128], index: 5, kind: input, shape index: {}]   ;;  %s392_s6 = inlined_call_operand.<no memory space> [shape: f32[1,1], index: 6, kind: input, shape index: {}]   ;;  %s393_s7 = inlined_call_operand.vmem [shape: f32[8,1], index: 7, kind: output, shape index: {}]  }
   0x1   :  { %256 = vmatprep.subr.bf16.mxu0 %v296_v0  ;;  %v286_v1 = vld [vmem:[%s386_s1] sm:$0xff]   ;;  %260 = vmatprep.mubr.msk.bf16.mxu0 %vm297_vm0, %v296_v0  ;;  %v287_v2 = vld [vmem:[%s386_s1 + $0x8] sm:$0xff]   ;;  %v290_v7 = vld [vmem:[%s388_s3 + $0x10] sm:$0xff]   ;;  %v222_v30 = vstv %s392_s6 }
   0x2   :  { %264 = vmatprep.subr.bf16.mxu1 %v296_v0  ;;  %280 = vmatprep.mubr.msk.bf16.mxu1 %vm297_vm0, %v296_v0  ;;  %v28_v3 = vld [vmem:[%s387_s0] sm:$0xff]  ;;  %v289_v6 = vld [vmem:[%s388_s3 + $0x8] sm:$0xff]   ;;  %v291_v8 = vld [vmem:[%s388_s3 + $0x18] sm:$0xff]  }
   0x3   :  { %257 = vmatpush3.bf16.msra.mxu0 %v286_v1  ;;  %v288_v4 = vld [vmem:[%s388_s3] sm:$0xff]   ;;  %v29_v5 = vpack.c.bf16 %v28_v3, %v28_v3  ;;  %v293_v10 = vld [vmem:[%s388_s3 + $0x28] sm:$0xff]   ;;  %v294_v11 = vld [vmem:[%s388_s3 + $0x30] sm:$0xff]  }
   0x4   :  { %258 = vmatprep.subr.bf16.mxu0 %v296_v0  ;;  %265 = vmatpush3.bf16.msra.mxu1 %v288_v4  ;;  %v292_v9 = vld [vmem:[%s388_s3 + $0x20] sm:$0xff]   ;;  %v295_v12 = vld [vmem:[%s388_s3 + $0x38] sm:$0xff]  }
   0x5   :  { %266 = vmatprep.subr.bf16.mxu1 %v296_v0  ;;  %v230_v13 = vld [vmem:[%s389_s2] ss:$0 sm:$0xff] }
   0x6   :  { %v234_v21 = vld [vmem:[%s390_s4] ss:$0 sm:$0xff] }
   0x7   :  { %259 = vmatpush3.bf16.msra.mxu0 %v287_v2  ;;  %v243_v26 = vld [vmem:[%s391_s5] ss:$0 sm:$0xff] }
   0x8   :  { %267 = vmatpush3.bf16.msra.mxu1 %v289_v6 }
   0x9   :  { %268 = vmatprep.subr.bf16.mxu1 %v296_v0 }
   0xa   :  { %261 = vmatmul.mubr.msk.bf16.vlgmr.msra.gmra.mrb[0].mxu0 %vm53_vm1, %v29_v5 }
   0xc   :  { %269 = vmatpush3.bf16.msra.mxu1 %v290_v7 }
   0xd   :  { %270 = vmatprep.subr.bf16.mxu1 %v296_v0 }
  0x10   :  { %271 = vmatpush3.bf16.msra.mxu1 %v291_v8 }
  0x11   :  { %272 = vmatprep.subr.bf16.mxu1 %v296_v0 }
  0x14   :  { %273 = vmatpush3.bf16.msra.mxu1 %v292_v9 }
  0x15   :  { %274 = vmatprep.subr.bf16.mxu1 %v296_v0 }
  0x18   :  { %275 = vmatpush3.bf16.msra.mxu1 %v293_v10 }
  0x19   :  { %276 = vmatprep.subr.bf16.mxu1 %v296_v0 }
  0x1c   :  { %277 = vmatpush3.bf16.msra.mxu1 %v294_v11 }
  0x1d   :  { %278 = vmatprep.subr.bf16.mxu1 %v296_v0 }
  0x20   :  { %279 = vmatpush3.bf16.msra.mxu1 %v295_v12 }
  0xdd   :  { %v91_v14 = vpop.f32.mrb[0].mxu0 }
  0xde   :  { %v92_v15 = vadd.f32 %v230_v13, %v91_v14  ;;  %v262_v16 = vpop.f32.mrb[1].mxu0 }
  0xdf   :  { %v94_v17 = vpop.f32.mrb[2].mxu0 }
  0xe0   :  { %v97_v18 = vmax.f32 %v92_v15, 0.0  ;;  %v263_v19 = vpop.f32.mrb[3].mxu0 }
  0xe2   :  { %v98_v20 = vpack.c.bf16 %v97_v18, %v97_v18 }
  0xe4   :  { %281 = vmatmul.mubr.bf16.vlgmr.msra.gmra.mrb[0].mxu1 %v98_v20 }
 0x1b7   :  { %v204_v22 = vpop.f32.mrb[0].mxu1 }
 0x1b8   :  { %v205_v23 = vadd.f32 %v234_v21, %v204_v22  ;;  %v282_v24 = vpop.f32.mrb[1].mxu1 }
 0x1b9   :  { %v207_v25 = vpop.f32.mrb[2].mxu1 }
 0x1ba   :  { %v210_v27 = vmax.f32 %v205_v23, 0.0  ;;  %v283_v28 = vpop.f32.mrb[3].mxu1 }
 0x1bc   :  { %v218_v29 = vmul.f32 %v243_v26, %v210_v27 }
 0x1be   :  { %219 = vadd.xlane.f32.xlu0 %v218_v29 }
 0x24b   :  { %v220_v31 = vpop.xlane.xlu0 %219 }
 0x24c   :  { %v223_v32 = vadd.f32 %v222_v30, %v220_v31 }
 0x24e   :  { %225 = vst.msk [vmem:[%s393_s7] sm:$0xff] %vm224_vm2, %v223_v32 }

</bundles_post_ra>
